<compile_context>
chip_gen: v7x
topology: tpu7x:2x2x1
jax: 0.10.0
libtpu: 0.0.40
codegen_flags: <defaults>
</compile_context>

<pallas_src>
import functools

import jax
import jax.numpy as jnp
from jax.experimental import pallas as pl
from jax.experimental.pallas import tpu as pltpu

EPS = 1e-6          # torch.nn.functional.pairwise_distance default eps
_NP_SPLITS = 2      # batch splits -> 2-TensorCore parallelism on v7x
_SUBLANE = 8
_LANE = 128


def _triplet_loss_kernel(a_ref, p_ref, n_ref, o_ref, acc_ref, *,
                         tile_rows, b_real, margin):
    """One (tile_rows, D) batch tile: accumulate sum of per-row triplet losses
    into acc_ref; write this split's partial sum to o_ref on the last step."""
    split = pl.program_id(0)        # "parallel" axis (megacore on v7x)
    step = pl.program_id(1)         # "arbitrary" reduction axis
    n_steps = pl.num_programs(1)

    @pl.when(step == 0)
    def _():
        acc_ref[...] = jnp.zeros_like(acc_ref)

    a = a_ref[...]
    p = p_ref[...]
    n = n_ref[...]

    # torch pairwise_distance convention: ||x1 - x2 + eps||_2 along last dim.
    dp = a - p + EPS
    dn = a - n + EPS
    d_pos = jnp.sqrt(jnp.sum(dp * dp, axis=-1, keepdims=True))   # (TB, 1)
    d_neg = jnp.sqrt(jnp.sum(dn * dn, axis=-1, keepdims=True))   # (TB, 1)
    losses = jnp.maximum(d_pos - d_neg + margin, 0.0)            # (TB, 1)

    # Mask rows past the true batch size: zero-padded rows would otherwise
    # each contribute exactly `margin` to the sum.
    row0 = (split * n_steps + step) * tile_rows
    rows = jax.lax.broadcasted_iota(jnp.int32, (tile_rows, 1), 0) + row0
    losses = jnp.where(rows < b_real, losses, 0.0)

    acc_ref[...] += jnp.sum(losses, axis=0, keepdims=True)       # (1, 1)

    @pl.when(step == n_steps - 1)
    def _():
        # Lane-dense (8, 128) output block; every element carries the partial.
        o_ref[...] = jnp.broadcast_to(acc_ref[...], o_ref.shape)


def _round_up(x, m):
    return ((x + m - 1) // m) * m


def triplet_loss(anchor, positive, negative, margin=1.0, *, tile_rows=None):
    assert anchor.shape == positive.shape == negative.shape
    assert anchor.ndim == 2
    B, D = anchor.shape

    # ---- Tile-size selection (generation-portable VMEM budget) --------------
    # Keep 3 inputs x 2 pipeline buffers x tile_rows x D x 4B under ~16 MiB so
    # the pipeline stays double-buffered even on v7x (64 MiB physical VMEM,
    # 32 MiB scoped default); v5e/v6e have more headroom.
    if tile_rows is None:
        budget_bytes = 16 * 1024 * 1024
        tile_rows = budget_bytes // (3 * 2 * D * 4)
        tile_rows = max(_SUBLANE, min(1024, (tile_rows // _SUBLANE) * _SUBLANE))
        # Don't make tiles bigger than each split's share of the batch needs.
        tile_rows = min(tile_rows, _round_up(pl.cdiv(B, _NP_SPLITS), _SUBLANE))
    assert tile_rows % _SUBLANE == 0

    steps = pl.cdiv(B, _NP_SPLITS * tile_rows)      # reduction steps per split
    b_pad = _NP_SPLITS * steps * tile_rows
    if b_pad != B:
        pad = ((0, b_pad - B), (0, 0))
        anchor = jnp.pad(anchor, pad)
        positive = jnp.pad(positive, pad)
        negative = jnp.pad(negative, pad)

    in_spec = pl.BlockSpec((tile_rows, D), lambda s, i: (s * steps + i, 0))
    out_spec = pl.BlockSpec((_SUBLANE, _LANE), lambda s, i: (s, 0))

    kernel = functools.partial(
        _triplet_loss_kernel,
        tile_rows=tile_rows, b_real=B, margin=float(margin))

    # Explicit scoped-VMEM limit: raise above v5e's 16 MiB default, but stay
    # comfortably inside v7x's 64 MiB physical VMEM.
    vmem_needed = 3 * 2 * tile_rows * D * 4 + 4 * _SUBLANE * _LANE * 4
    vmem_limit = int(min(max(vmem_needed + (8 << 20), 32 << 20), 48 << 20))

    out = pl.pallas_call(
        kernel,
        out_shape=jax.ShapeDtypeStruct((_NP_SPLITS * _SUBLANE, _LANE), jnp.float32),
        grid_spec=pltpu.PrefetchScalarGridSpec(
            num_scalar_prefetch=0,
            grid=(_NP_SPLITS, steps),
            in_specs=[in_spec, in_spec, in_spec],
            out_specs=out_spec,
            scratch_shapes=[pltpu.VMEM((1, 1), jnp.float32)],
        ),
        compiler_params=pltpu.CompilerParams(
            dimension_semantics=("parallel", "arbitrary"),
            vmem_limit_bytes=vmem_limit,
        ),
        cost_estimate=pl.CostEstimate(
            flops=8 * b_pad * D,
            transcendentals=2 * b_pad,
            bytes_accessed=3 * b_pad * D * 4 + _NP_SPLITS * _SUBLANE * _LANE * 4,
        ),
    )(anchor, positive, negative)

    partial_sums = out[::_SUBLANE, 0]               # one partial sum per split
    return jnp.sum(partial_sums) / B


def triplet_loss_ref(anchor, positive, negative, margin=1.0):
    # pure-JAX reference for correctness check (matches torch semantics)
    d_pos = jnp.sqrt(jnp.sum((anchor - positive + EPS) ** 2, axis=-1))
    d_neg = jnp.sqrt(jnp.sum((anchor - negative + EPS) ** 2, axis=-1))
    return jnp.mean(jnp.maximum(d_pos - d_neg + margin, 0.0))


if __name__ == "__main__":
    key = jax.random.PRNGKey(0)

    # Test 1: small embedding batch (shapes implied by the module).
    B, D = 8, 32
    k_a, k_p, k_n = jax.random.split(key, 3)
    anchor = jax.random.normal(k_a, (B, D), dtype=jnp.float32)
    positive = jax.random.normal(k_p, (B, D), dtype=jnp.float32)
    negative = jax.random.normal(k_n, (B, D), dtype=jnp.float32)

    loss = triplet_loss(anchor, positive, negative)
    jax.block_until_ready(loss)
    ref = triplet_loss_ref(anchor, positive, negative)
    assert jnp.allclose(loss, ref, rtol=1e-5, atol=1e-5), (loss, ref)

    # Test 2: batch not a multiple of the tile -> exercises row masking.
    B2, D2 = 13, 160
    k_a, k_p, k_n = jax.random.split(jax.random.PRNGKey(1), 3)
    a2 = jax.random.normal(k_a, (B2, D2), dtype=jnp.float32)
    p2 = jax.random.normal(k_p, (B2, D2), dtype=jnp.float32)
    n2 = jax.random.normal(k_n, (B2, D2), dtype=jnp.float32)
    loss2 = triplet_loss(a2, p2, n2)
    jax.block_until_ready(loss2)
    assert jnp.allclose(loss2, triplet_loss_ref(a2, p2, n2), rtol=1e-5, atol=1e-5)

    # Test 3: force small tiles so the accumulation loop runs multiple steps.
    B3, D3 = 40, 96
    k_a, k_p, k_n = jax.random.split(jax.random.PRNGKey(2), 3)
    a3 = jax.random.normal(k_a, (B3, D3), dtype=jnp.float32)
    p3 = jax.random.normal(k_p, (B3, D3), dtype=jnp.float32)
    n3 = jax.random.normal(k_n, (B3, D3), dtype=jnp.float32)
    loss3 = triplet_loss(a3, p3, n3, tile_rows=8)
    jax.block_until_ready(loss3)
    assert jnp.allclose(loss3, triplet_loss_ref(a3, p3, n3), rtol=1e-5, atol=1e-5)

    print("KERNEL_OK")
</pallas_src>

<mosaic_0001>
module attributes {stable_mosaic.version = 11 : i64} {
  func.func @_triplet_loss_kernel(%arg0: i32, %arg1: i32, %arg2: memref<8x32xf32, #tpu.memory_space<vmem>>, %arg3: memref<8x32xf32, #tpu.memory_space<vmem>>, %arg4: memref<8x32xf32, #tpu.memory_space<vmem>>, %arg5: memref<8x128xf32, #tpu.memory_space<vmem>>, %arg6: memref<1x1xf32, #tpu.memory_space<vmem>>) attributes {dimension_semantics = [#tpu.dimension_semantics<parallel>, #tpu.dimension_semantics<arbitrary>], iteration_bounds = array<i64: 2, 1>, scalar_prefetch = 0 : i64, scratch_operands = 1 : i64, tpu.core_type = #tpu.core_type<tc>, window_params = [{transform_indices = @transform_0, window_bounds = array<i64: 8, 32>}, {transform_indices = @transform_1, window_bounds = array<i64: 8, 32>}, {transform_indices = @transform_2, window_bounds = array<i64: 8, 32>}, {transform_indices = @transform_3, window_bounds = array<i64: 8, 128>}]} {
    %c0_i32 = arith.constant 0 : i32
    %0 = arith.cmpi eq, %arg1, %c0_i32 : i32
    %1 = arith.extui %0 : i1 to i32
    %c0_i32_0 = arith.constant 0 : i32
    %2 = arith.cmpi ne, %1, %c0_i32_0 : i32
    scf.if %2 {
      %cst_20 = arith.constant 0.000000e+00 : f32
      %43 = vector.broadcast %cst_20 : f32 to vector<1x1xf32>
      %c0_21 = arith.constant 0 : index
      %c0_22 = arith.constant 0 : index
      %44 = vector.load %arg6[%c0_21, %c0_22] : memref<1x1xf32, #tpu.memory_space<vmem>>, vector<1x1xf32>
      tpu.vector_store %arg6[%c0_21, %c0_22], %43 {strides = array<i32>} : memref<1x1xf32, #tpu.memory_space<vmem>>, vector<1x1xf32>,
    } else {
    }
    %c0 = arith.constant 0 : index
    %c0_1 = arith.constant 0 : index
    %3 = vector.load %arg2[%c0, %c0_1] : memref<8x32xf32, #tpu.memory_space<vmem>>, vector<8x32xf32>
    %c0_2 = arith.constant 0 : index
    %c0_3 = arith.constant 0 : index
    %4 = vector.load %arg3[%c0_2, %c0_3] : memref<8x32xf32, #tpu.memory_space<vmem>>, vector<8x32xf32>
    %c0_4 = arith.constant 0 : index
    %c0_5 = arith.constant 0 : index
    %5 = vector.load %arg4[%c0_4, %c0_5] : memref<8x32xf32, #tpu.memory_space<vmem>>, vector<8x32xf32>
    %6 = arith.subf %3, %4 : vector<8x32xf32>
    %cst = arith.constant 9.99999997E-7 : f32
    %7 = vector.broadcast %cst : f32 to vector<8x32xf32>
    %8 = arith.addf %6, %7 : vector<8x32xf32>
    %9 = arith.subf %3, %5 : vector<8x32xf32>
    %cst_6 = arith.constant 9.99999997E-7 : f32
    %10 = vector.broadcast %cst_6 : f32 to vector<8x32xf32>
    %11 = arith.addf %9, %10 : vector<8x32xf32>
    %12 = arith.mulf %8, %8 : vector<8x32xf32>
    %cst_7 = arith.constant dense<0.000000e+00> : vector<8xf32>
    %13 = vector.multi_reduction <add>, %12, %cst_7 [1] : vector<8x32xf32> to vector<8xf32>
    %14 = vector.shape_cast %13 : vector<8xf32> to vector<8x1xf32>
    %15 = math.sqrt %14 : vector<8x1xf32>
    %16 = arith.mulf %11, %11 : vector<8x32xf32>
    %cst_8 = arith.constant dense<0.000000e+00> : vector<8xf32>
    %17 = vector.multi_reduction <add>, %16, %cst_8 [1] : vector<8x32xf32> to vector<8xf32>
    %18 = vector.shape_cast %17 : vector<8xf32> to vector<8x1xf32>
    %19 = math.sqrt %18 : vector<8x1xf32>
    %20 = arith.subf %15, %19 : vector<8x1xf32>
    %cst_9 = arith.constant 1.000000e+00 : f32
    %21 = vector.broadcast %cst_9 : f32 to vector<8x1xf32>
    %22 = arith.addf %20, %21 : vector<8x1xf32>
    %cst_10 = arith.constant 0.000000e+00 : f32
    %23 = vector.broadcast %cst_10 : f32 to vector<8x1xf32>
    %24 = arith.maximumf %22, %23 : vector<8x1xf32>
    %c1_i32 = arith.constant 1 : i32
    %25 = arith.muli %arg0, %c1_i32 : i32
    %26 = arith.addi %25, %arg1 : i32
    %c8_i32 = arith.constant 8 : i32
    %27 = arith.muli %26, %c8_i32 : i32
    %28 = tpu.iota {dimensions = array<i32: 0>} : vector<8x1xi32>
    %29 = vector.broadcast %27 : i32 to vector<8x1xi32>
    %30 = arith.addi %28, %29 : vector<8x1xi32>
    %c8_i32_11 = arith.constant 8 : i32
    %31 = vector.broadcast %c8_i32_11 : i32 to vector<8x1xi32>
    %32 = arith.cmpi slt, %30, %31 : vector<8x1xi32>
    %cst_12 = arith.constant 0.000000e+00 : f32
    %33 = vector.broadcast %cst_12 : f32 to vector<8x1xf32>
    %34 = arith.select %32, %24, %33 : vector<8x1xi1>, vector<8x1xf32>
    %c0_13 = arith.constant 0 : index
    %c0_14 = arith.constant 0 : index
    %35 = vector.load %arg6[%c0_13, %c0_14] : memref<1x1xf32, #tpu.memory_space<vmem>>, vector<1x1xf32>
    %cst_15 = arith.constant dense<0.000000e+00> : vector<1xf32>
    %36 = vector.multi_reduction <add>, %34, %cst_15 [0] : vector<8x1xf32> to vector<1xf32>
    %37 = vector.shape_cast %36 : vector<1xf32> to vector<1x1xf32>
    %38 = arith.addf %35, %37 : vector<1x1xf32>
    %c0_16 = arith.constant 0 : index
    %c0_17 = arith.constant 0 : index
    %39 = vector.load %arg6[%c0_16, %c0_17] : memref<1x1xf32, #tpu.memory_space<vmem>>, vector<1x1xf32>
    tpu.vector_store %arg6[%c0_16, %c0_17], %38 {strides = array<i32>} : memref<1x1xf32, #tpu.memory_space<vmem>>, vector<1x1xf32>,
    %c0_i32_18 = arith.constant 0 : i32
    %40 = arith.cmpi eq, %arg1, %c0_i32_18 : i32
    %41 = arith.extui %40 : i1 to i32
    %c0_i32_19 = arith.constant 0 : i32
    %42 = arith.cmpi ne, %41, %c0_i32_19 : i32
    scf.if %42 {
      %c0_20 = arith.constant 0 : index
      %c0_21 = arith.constant 0 : index
      %43 = vector.load %arg6[%c0_20, %c0_21] : memref<1x1xf32, #tpu.memory_space<vmem>>, vector<1x1xf32>
      %44 = vector.shape_cast %43 : vector<1x1xf32> to vector<1x1xf32>
      %45 = vector.broadcast %44 : vector<1x1xf32> to vector<8x128xf32>
      %c0_22 = arith.constant 0 : index
      %c0_23 = arith.constant 0 : index
      %46 = vector.load %arg5[%c0_22, %c0_23] : memref<8x128xf32, #tpu.memory_space<vmem>>, vector<8x128xf32>
      tpu.vector_store %arg5[%c0_22, %c0_23], %45 {strides = array<i32>} : memref<8x128xf32, #tpu.memory_space<vmem>>, vector<8x128xf32>,
    } else {
    }
    return
  }
  func.func @transform_0(%arg0: i32, %arg1: i32) -> (i32, i32) {
    %c1_i32 = arith.constant 1 : i32
    %0 = arith.muli %arg0, %c1_i32 : i32
    %1 = arith.addi %0, %arg1 : i32
    %c0_i32 = arith.constant 0 : i32
    %c0_i32_0 = arith.constant 0 : i32
    return %1, %c0_i32 : i32, i32
  }
  func.func @transform_1(%arg0: i32, %arg1: i32) -> (i32, i32) {
    %c1_i32 = arith.constant 1 : i32
    %0 = arith.muli %arg0, %c1_i32 : i32
    %1 = arith.addi %0, %arg1 : i32
    %c0_i32 = arith.constant 0 : i32
    %c0_i32_0 = arith.constant 0 : i32
    return %1, %c0_i32 : i32, i32
  }
  func.func @transform_2(%arg0: i32, %arg1: i32) -> (i32, i32) {
    %c1_i32 = arith.constant 1 : i32
    %0 = arith.muli %arg0, %c1_i32 : i32
    %1 = arith.addi %0, %arg1 : i32
    %c0_i32 = arith.constant 0 : i32
    %c0_i32_0 = arith.constant 0 : i32
    return %1, %c0_i32 : i32, i32
  }
  func.func @transform_3(%arg0: i32, %arg1: i32) -> (i32, i32) {
    %c0_i32 = arith.constant 0 : i32
    %c0_i32_0 = arith.constant 0 : i32
    return %arg0, %c0_i32 : i32, i32
  }
}

</mosaic_0001>

<bundles_post_ra>
// kernel: tpu_custom_call.1
= control target key start
LH: loop header
LB: loop body
LE: loop exit
PB: predicated region body
PF: predicated region fallthrough
CT: control target
= control target key end

     0   :  { %s1062_s0 = inlined_call_operand.hbm [shape: f32[16,32], index: 0, kind: input, shape index: {}]   ;;  %s1063_s1 = inlined_call_operand.hbm [shape: f32[16,32], index: 1, kind: input, shape index: {}]   ;;  %s1064_s2 = inlined_call_operand.hbm [shape: f32[16,32], index: 2, kind: input, shape index: {}]   ;;  %s1065_s3 = inlined_call_operand.hbm [shape: f32[16,128], index: 3, kind: output, shape index: {}]  }
   0x1   :  { %1071 = sst [smem:[#allocation16_spill]] %s1063_s1 }
   0x2   :  { %8 = vsyncpa [#allocation4], 0 }
   0x3   :  { %10 = vsyncpa [#allocation4 + $0x1], 0 }
   0x4   :  { %11 = vsyncpa [#allocation7], 0 }
   0x5   :  { %13 = vsyncpa [#allocation7 + $0x1], 0 }
   0x6   :  { %14 = vsyncpa [#allocation5], 0 }
   0x7   :  { %16 = vsyncpa [#allocation5 + $0x1], 0  ;;  %s795_s12 = smov 0   ;;  %s797_s13 = smov 0  }
   0x8   :  { %s799_s14 = smov 0   ;;  %s801_s15 = smov 0  }
   0x9   :  { %s803_s16 = smov 0   ;;  %s805_s17 = smov 0  }
   0xa LB: > { %1072 = sst [smem:[#allocation13_spill]] %s763_s16  ;;  %s826_s18 = sadd.s32 4294967295, %s767_s17   ;;  %s767_s17 = sphi %s805_s17, %s22_s17   ;;  %s763_s16 = sphi %s803_s16, %s1093_s16   ;;  %s759_s15 = sphi %s801_s15, %s1092_s15   ;;  %s755_s14 = sphi %s799_s14, %s1096_s14   ;;  %s751_s13 = sphi %s797_s13, %s1095_s13   ;;  %s747_s12 = sphi %s795_s12, %s1094_s12  }
   0xb   : > { %s491_s19 = sadd.s32 4294967294, %s767_s17   ;;  %s34_s20 = sadd.s32 1, %s763_s16 }
   0xc   : > { %s43_s21 = sadd.s32 1, %s755_s14  ;;  %p36_p0 = scmp.ge.s32.totalorder %s34_s20, 2 }
   0xd   : > { %p50_p1 = scmp.ne.s32.totalorder %s755_s14, %s751_s13  ;;  %p51_p2 = scmp.eq.s32.totalorder %s767_s17, 0 }
   0xe   : > { %p56_p3 = scmp.ne.s32.totalorder %s751_s13, %s747_s12  ;;  %s1098_s20 = smov (%p36_p0, %s34_s20), 0 }
   0xf   : > { %1073 = sst [smem:[#allocation14_spill]] %s1098_s20  ;;  %p838_p4 = por %p51_p2, %p50_p1 }
  0x10   : > { %p57_p5 = scmp.eq.s32.totalorder %s826_s18, 0  ;;  %s40_s23 = ssub.s32 %s763_s16, %s1098_s20 }
  0x11   : > { %p136_p6 = scmp.eq.s32.totalorder %s826_s18, 1  ;;  %p41_p7 = scmp.eq.s32.totalorder %s40_s23, 0 }
  0x12   : > { %p846_p8 = por %p57_p5, %p56_p3  ;;  %p142_p10 = scmp.eq.s32.totalorder %s491_s19, 1 }
  0x13   : > { %p850_p9 = por %p136_p6, %p50_p1  ;;  %p533_p13 = scmp.lt.s32.totalorder %s767_s17, 2 }
  0x14   : > { %s1075_s24 = scalar_select %p846_p8, 1, 0 }
  0x15   : > { %s1076_s25 = scalar_select %p850_p9, 1, 0 }
  0x16   : > { %s855_s26 = scalar_select %p41_p7, %s755_s14, %s43_s21  }
  0x17   : > { %p857_p11 = por %p142_p10, %p56_p3  ;;  %s162_s28 = sand.u32 1, %s755_s14  }
  0x18   : > { %1077 = sst [smem:[#allocation15_spill]] %s855_s26  ;;  %s866_s29 = sshll.u32 %s162_s28, 3 }
  0x19   : > { %s1078_s27 = scalar_select %p857_p11, 1, 0 }
  0x1a   : > { %s869_s30 = sshll.u32 %s763_s16, 7  ;;  %p873_p0 = pnand %p533_p13, %p838_p4 }
  0x1b   : > { %s181_s5 = sand.u32 1, %s767_s17   ;;  %s1080_s1 = sld [smem:[#allocation16_spill]] }
  0x1c   : > { %s1079_s4 = scalar_select %p873_p0, 1, 0 }
  0x1d   : > { %s185_s9 = scalar_lea.vmem [#allocation6], %s866_s29  ;;  %s889_s11 = scalar_lea.sflag [#allocation7], %s181_s5 }
  0x1e   : > { %s193_s10 = sshll.u32 %s185_s9, 4  ;;  %p895_p4 = pneg %p873_p0  ;;  %s886_s10 = int_to_ptr.vmem [resolvable:$true] %s193_s10 }
  0x21   : > { %s882_s8 = scalar_lea.hbm %s1080_s1, %s869_s30  ;;  %s596_s6 = scalar_lea.hbm %s1080_s1, 256 }
  0x22   : > { %s591_s19 = scalar_lea.hbm %s882_s8, 128  ;;  %p597_p7 = scmp.lt.u32.totalorder %s882_s8, %s1080_s1 }
  0x23   : > { %p592_p3 = scmp.ne.s32.totalorder %s882_s8, %s591_s19  ;;  %p598_p10 = scmp.lt.u32.totalorder %s596_s6, %s591_s19 }
  0x24   : > { %p600_p12 = scmp.lt.u32.totalorder %s591_s19, %s882_s8 }
  0x25   : > { %p594_p5 = pnand %p895_p4, %p592_p3  ;;  %p599_p13 = por %p598_p10, %p597_p7 }
  0x27   : > { %p595_p6 = pneg %p594_p5  ;;  %p601_p1 = por %p600_p12, %p599_p13 }
  0x29   : > { %p602_p2 = pnand %p601_p1, %p595_p6 }
  0x2b   : > { %605 = shalt.err (!%p602_p2)
}
  0x2c   : > { %s606_s5 = scalar_lea.vmem %s886_s10, 128  ;;  %s769_s22 = smov [#allocation6]  }
  0x2d   : > { %p607_p3 = scmp.ne.s32.totalorder %s886_s10, %s606_s5  ;;  %s611_s23 = sshll.u32 %s769_s22, 4  ;;  %s612_s23 = int_to_ptr.vmem [resolvable:$false] %s611_s23 }
  0x2e   : > { %s613_s7 = scalar_lea.vmem %s612_s23, 256  ;;  %p614_p9 = scmp.lt.s32.totalorder %s886_s10, %s612_s23 }
  0x2f   : > { %p609_p5 = pnand %p607_p3, %p895_p4  ;;  %p615_p8 = scmp.lt.s32.totalorder %s613_s7, %s606_s5 }
  0x31   : > { %p610_p11 = pneg %p609_p5  ;;  %p616_p7 = por %p615_p8, %p614_p9 }
  0x33   : > { %p617_p10 = pnand %p616_p7, %p610_p11 }
  0x35   : > { %620 = shalt.err (!%p617_p10)
}
  0x36   : > { %525 = dma.hbm_to_vmem [thread:$0]  (!%p873_p0), %s882_s8, 128, %s886_s10, %s889_s11  }
  0x37   : > { %p1082_p12 = scmp.lt.s32.totalorder %s767_s17, 3  ;;  %p1083_p1 = scmp.ge.s32.totalorder %s767_s17, 1 }
  0x38   : > { %s931_s5 = scalar_lea.hbm %s1062_s0, %s869_s30  ;;  %s166_s22 = scalar_lea.vmem [#allocation3], %s866_s29 }
  0x39   : > { %p923_p2 = pnand %p1083_p1, %p1082_p12  ;;  %s174_s23 = sshll.u32 %s166_s22, 4  ;;  %s934_s23 = int_to_ptr.vmem [resolvable:$true] %s174_s23 }
  0x3a   : > { %s940_s7 = scalar_lea.hbm %s1064_s2, %s869_s30  ;;  %s163_s1 = scalar_lea.sflag [#allocation4], %s162_s28 }
  0x3b   : > { %s1084_s19 = scalar_select %p923_p2, 1, 0 }
  0x3c   : > { %s621_s20 = scalar_lea.hbm %s931_s5, 128  ;;  %s626_s16 = scalar_lea.hbm %s1062_s0, 256 }
  0x3d   : > { %p622_p8 = scmp.ne.s32.totalorder %s931_s5, %s621_s20  ;;  %p627_p6 = scmp.lt.u32.totalorder %s931_s5, %s1062_s0 }
  0x3e   : > { %p628_p13 = scmp.lt.u32.totalorder %s626_s16, %s621_s20  ;;  %p630_p5 = scmp.lt.u32.totalorder %s621_s20, %s931_s5 }
  0x3f   : > { %p624_p9 = pnand %p622_p8, %p895_p4 }
  0x40   : > { %p629_p3 = por %p628_p13, %p627_p6 }
  0x41   : > { %p625_p11 = pneg %p624_p9 }
  0x42   : > { %p631_p7 = por %p630_p5, %p629_p3 }
  0x44   : > { %p632_p10 = pnand %p631_p7, %p625_p11 }
  0x46   : > { %635 = shalt.err (!%p632_p10)
}
  0x47   : > { %s636_s28 = scalar_lea.vmem %s934_s23, 128  ;;  %s770_s30 = smov [#allocation3]  }
  0x48   : > { %p637_p12 = scmp.ne.s32.totalorder %s934_s23, %s636_s28  ;;  %s641_s8 = sshll.u32 %s770_s30, 4  ;;  %s642_s8 = int_to_ptr.vmem [resolvable:$false] %s641_s8 }
  0x49   : > { %s643_s26 = scalar_lea.vmem %s642_s8, 256  ;;  %p644_p9 = scmp.lt.s32.totalorder %s934_s23, %s642_s8 }
  0x4a   : > { %p639_p1 = pnand %p637_p12, %p895_p4  ;;  %p645_p2 = scmp.lt.s32.totalorder %s643_s26, %s636_s28 }
  0x4c   : > { %p640_p8 = pneg %p639_p1  ;;  %p646_p6 = por %p645_p2, %p644_p9 }
  0x4e   : > { %p647_p13 = pnand %p646_p6, %p640_p8 }
  0x50   : > { %650 = shalt.err (!%p647_p13)
}
  0x51   : > { %522 = dma.hbm_to_vmem [thread:$0]  (!%p873_p0), %s931_s5, 128, %s934_s23, %s163_s1  }
  0x52   : > { %s204_s16 = scalar_lea.vmem [#allocation8], %s866_s29  ;;  %s651_s10 = scalar_lea.hbm %s940_s7, 128 }
  0x53   : > { %s212_s20 = sshll.u32 %s204_s16, 4  ;;  %p652_p11 = scmp.ne.s32.totalorder %s940_s7, %s651_s10  ;;  %s213_s20 = int_to_ptr.vmem [resolvable:$true] %s212_s20 }
  0x54   : > { %s656_s22 = scalar_lea.hbm %s1064_s2, 256  ;;  %p657_p5 = scmp.lt.u32.totalorder %s940_s7, %s1064_s2 }
  0x55   : > { %p654_p2 = pnand %p652_p11, %p895_p4  ;;  %p658_p7 = scmp.lt.u32.totalorder %s656_s22, %s651_s10 }
  0x56   : > { %p660_p12 = scmp.lt.u32.totalorder %s651_s10, %s940_s7 }
  0x57   : > { %p655_p3 = pneg %p654_p2  ;;  %p659_p10 = por %p658_p7, %p657_p5 }
  0x59   : > { %p661_p1 = por %p660_p12, %p659_p10 }
  0x5b   : > { %p662_p8 = pnand %p661_p1, %p655_p3 }
  0x5d   : > { %665 = shalt.err (!%p662_p8)
}
  0x5e   : > { %s666_s1 = scalar_lea.vmem %s213_s20, 128  ;;  %s771_s29 = smov [#allocation8]  }
  0x5f   : > { %p667_p9 = scmp.ne.s32.totalorder %s213_s20, %s666_s1  ;;  %s671_s5 = sshll.u32 %s771_s29, 4  ;;  %s672_s5 = int_to_ptr.vmem [resolvable:$false] %s671_s5 }
  0x60   : > { %s673_s23 = scalar_lea.vmem %s672_s5, 256  ;;  %p674_p11 = scmp.lt.s32.totalorder %s213_s20, %s672_s5 }
  0x61   : > { %p669_p6 = pnand %p667_p9, %p895_p4  ;;  %p675_p2 = scmp.lt.s32.totalorder %s673_s23, %s666_s1 }
  0x63   : > { %p670_p13 = pneg %p669_p6  ;;  %p676_p0 = por %p675_p2, %p674_p11 }
  0x65   : > { %p677_p5 = pnand %p676_p0, %p670_p13 }
  0x67   : > { %680 = shalt.err (!%p677_p5)
}
  0x68   : > { %p1085_p7 = scmp.ne.s32.totalorder %s1079_s4, 0  ;;  %p1086_p3 = scmp.ne.s32.totalorder %s1084_s19, 0 }
  0x69   : > { %s987_s21 = sand.u32 (!%p1086_p3), 1, %s751_s13   ;;  %p1087_p0 = scmp.ne.s32.totalorder (!%p1086_p3), %s1075_s24, 0 }
  0x6a   : > { %528 = dma.hbm_to_vmem [thread:$0]  (!%p1085_p7), %s940_s7, 128, %s213_s20, %s889_s11  }
  0x6b   : > { %221 = sbr.rel (%p1086_p3) target bundleno = 458 (0x1ca), region = 32  ;;  %s990_s8 = sshll.u32 (!%p1086_p3), %s987_s21, 3 }
  0x6c   : > { %s224_s26 = scalar_lea.sflag (!%p1086_p3), [#allocation4], %s987_s21  ;;  %s227_s16 = scalar_lea.vmem (!%p1086_p3), [#allocation3], %s990_s8 }
  0x72   : > { %734 = dma.done.wait (%p1087_p0), %s224_s26, 128  }
  0x73   : > { %736 = vsyncadd (%p1087_p0), %s224_s26, 4294967168  ;;  %s232_s4 = sand.u32 1, %s826_s18   ;;  %s236_s19 = scalar_lea.vmem [#allocation6], %s990_s8 }
  0x74   : > { %s233_s11 = scalar_lea.sflag [#allocation7], %s232_s4 }
  0x75   : > { %738 = dma.done.wait (%p1087_p0), %s233_s11, 256  }
  0x76   : > { %740 = vsyncadd (%p1087_p0), %s233_s11, 4294967040  ;;  %vm285_vm0 = vcmask 0   ;;  %v772_v0 = vmov 0.0   ;;  %v287_v1 = vld [vmem:[%s227_s16] sm:$0xff]  ;;  %v288_v2 = vld [vmem:[%s236_s19] sm:$0xff]  ;;  %s245_s7 = scalar_lea.vmem [#allocation8], %s990_s8  ;;  %v322_v16 = vlaneseq }
  0x77   : > { %286 = vst.msk [vmem:[#allocation2] sm:$0x1] %vm285_vm0, %v772_v0  ;;  %v289_v3 = vld [vmem:[%s245_s7] sm:$0xff]  ;;  %v290_v4 = vsub.f32 %v287_v1, %v288_v2  ;;  %vm295_vm1 = vcmask 261120   ;;  %v773_v12 = vmov 0   ;;  %s505_s18 = sshll.u32 %s759_s15, 3 }
  0x78   : > { %v292_v5 = vsub.f32 %v287_v1, %v289_v3  ;;  %585 = vset.pattern.permute.xlu1 %v773_v12  ;;  %586 = vset.pattern.permute.xlu0 %v773_v12  ;;  %v323_v19 = vshrl.u32 %v322_v16, 7  ;;  %v324_v21 = vstv %s505_s18  ;;  %s277_s24 = scalar_lea.vmem [#allocation9], %s990_s8  ;;  %s508_s10 = sshll.u32 %s759_s15, 7 }
  0x79   : > { %v291_v6 = vadd.f32 1e-06, %v290_v4  ;;  %s366_s20 = sshll.u32 %s277_s24, 4  ;;  %s1015_s22 = scalar_lea.hbm %s1065_s3, %s508_s10  ;;  %s1010_s20 = int_to_ptr.vmem [resolvable:$true] %s366_s20 }
  0x7a   : > { %v293_v7 = vadd.f32 1e-06, %v292_v5  ;;  %v325_v27 = vadd.s32 %v324_v21, %v323_v19  ;;  %s353_s28 = scalar_lea.sflag [#allocation5], %s987_s21  ;;  %s681_s30 = scalar_lea.vmem %s1010_s20, 128 }
  0x7b   : > { %v294_v8 = vmul.f32 %v291_v6, %v291_v6  ;;  %p682_p4 = scmp.ne.s32.totalorder %s1010_s20, %s681_s30  ;;  %p1088_p10 = scmp.ne.s32.totalorder %s1076_s25, 0 }
  0x7c   : > { %v306_v9 = vmul.f32 %v293_v7, %v293_v7  ;;  %vm326_vm6 = vcmp.lt.s32.totalorder %v325_v27, 8  ;;  %s774_s1 = smov [#allocation9]  }
  0x7d   : > { %v296_v10 = vsel %vm295_vm1, %v294_v8, 0.0  ;;  %p683_p12 = pnand %p682_p4, %p1088_p10  ;;  %s685_s15 = sshll.u32 %s774_s1, 4  ;;  %s686_s15 = int_to_ptr.vmem [resolvable:$false] %s685_s15 }
  0x7e   : > { %297 = vadd.xlane.f32.xlu0 %v296_v10  ;;  %v307_v11 = vsel %vm295_vm1, %v306_v9, 0.0  ;;  %v328_v38 = vld [vmem:[#allocation2] sm:$0x1]  ;;  %s687_s29 = scalar_lea.vmem %s686_s15, 256  ;;  %p688_p8 = scmp.lt.s32.totalorder %s1010_s20, %s686_s15 }
  0x7f   : > { %p684_p1 = pneg %p683_p12  ;;  %p689_p9 = scmp.lt.s32.totalorder %s687_s29, %s681_s30 }
  0x81   : > { %p690_p6 = por %p689_p9, %p688_p8 }
  0x82   : > { %308 = vadd.xlane.f32.xlu0 %v307_v11 }
  0x83   : > { %p691_p13 = pnand %p690_p6, %p684_p1 }
 0x10b   : > { %v298_v13 = vpop.xlane.xlu0 %297 }
 0x10c   : > { %587 = vrsqrt.f32 %v298_v13  ;;  %vm301_vm2 = vcmp.eq.f32.partialorder %v298_v13, inf  ;;  %v304_v23 = vand.u32 2147483648, %v298_v13  ;;  %vm303_vm4 = vcmp.eq.f32.partialorder %v298_v13, 0.0 }
 0x10f   : > { %v309_v14 = vpop.xlane.xlu0 %308 }
 0x110   : > { %589 = vrsqrt.f32 %v309_v14  ;;  %vm312_vm3 = vcmp.eq.f32.partialorder %v309_v14, inf  ;;  %v315_v24 = vand.u32 2147483648, %v309_v14  ;;  %vm314_vm5 = vcmp.eq.f32.partialorder %v309_v14, 0.0 }
 0x116   : > { %v588_v15 = vpop.eup %587 }
 0x117   : > { %v300_v17 = vmul.f32 %v588_v15, %v298_v13 }
 0x119   : > { %v302_v20 = vsel %vm301_vm2, %v298_v13, %v300_v17 }
 0x11a   : > { %v590_v18 = vpop.eup %589  ;;  %v305_v26 = vsel %vm303_vm4, %v304_v23, %v302_v20 }
 0x11b   : > { %v311_v22 = vmul.f32 %v590_v18, %v309_v14 }
 0x11d   : > { %v313_v25 = vsel %vm312_vm3, %v309_v14, %v311_v22 }
 0x11e   : > { %v316_v28 = vsel %vm314_vm5, %v315_v24, %v313_v25 }
 0x11f   : > { %v317_v29 = vsub.f32 %v305_v26, %v316_v28 }
 0x121   : > { %v318_v30 = vadd.f32 1.0, %v317_v29 }
 0x123   : > { %v319_v31 = vmax.f32 %v318_v30, 0.0 }
 0x125   : > { %v327_v32 = vsel %vm326_vm6, %v319_v31, 0.0 }
 0x126   : > { %v329_v33 = vrot.slane %v327_v32, 4 }
 0x128   : > { %v330_v34 = vadd.f32 %v329_v33, %v327_v32 }
 0x12a   : > { %v331_v35 = vrot.slane %v330_v34, 2 }
 0x12c   : > { %v332_v36 = vadd.f32 %v331_v35, %v330_v34 }
 0x12e   : > { %v333_v37 = vrot.slane %v332_v36, 1 }
 0x130   : > { %v334_v39 = vadd.f32 %v333_v37, %v332_v36 }
 0x132   : > { %v335_v40 = vadd.f32 %v334_v39, %v328_v38 }
 0x134   : > { %337 = vst.msk [vmem:[#allocation2] sm:$0x1] %vm285_vm0, %v335_v40 }
 0x13b   : > { %v506_v41 = vld [vmem:[#allocation2] ss:$0 sm:$0xff] }
 0x13c   : > { %348 = vperm.xlu1 %585, %v506_v41  }
 0x1bb   : > { %v349_v42 = vpop.permute.xlu1 %348 }
 0x1bc   : > { %351 = vst [vmem:[%s277_s24] sm:$0xff] %v349_v42 }
 0x1bd   : > { %694 = shalt.err (!%p691_p13)
}
 0x1be   : > { %s695_s5 = scalar_lea.hbm %s1015_s22, 128  ;;  %s699_s8 = scalar_lea.hbm %s1065_s3, 256 }
 0x1bf   : > { %p696_p11 = scmp.ne.s32.totalorder %s1015_s22, %s695_s5  ;;  %p700_p7 = scmp.lt.u32.totalorder %s1015_s22, %s1065_s3 }
 0x1c0   : > { %p701_p3 = scmp.lt.u32.totalorder %s699_s8, %s695_s5  ;;  %p703_p4 = scmp.lt.u32.totalorder %s695_s5, %s1015_s22 }
 0x1c1   : > { %p697_p2 = pnand %p696_p11, %p1088_p10 }
 0x1c2   : > { %p702_p0 = por %p701_p3, %p700_p7 }
 0x1c3   : > { %p698_p5 = pneg %p697_p2 }
 0x1c4   : > { %p704_p12 = por %p703_p4, %p702_p0 }
 0x1c6   : > { %p705_p1 = pnand %p704_p12, %p698_p5 }
 0x1c8   : > { %708 = shalt.err (!%p705_p1)
}
 0x1c9   : > { %517 = dma.vmem_to_hbm [thread:$0]  (%p1088_p10), %s1010_s20, 128, %s1015_s22, %s353_s28  }
 0x1ca PF: > { %s378_s4 = sand.u32 1, %s747_s12   ;;  %p1089_p8 = scmp.ne.s32.totalorder %s1078_s27, 0 }
 0x1cb   : > { %p1090_p9 = scmp.ge.s32.totalorder %s767_s17, 2  ;;  %s379_s11 = scalar_lea.sflag [#allocation5], %s378_s4 }
 0x1cd   : > { %p530_p6 = pnand %p1090_p9, %p1089_p8 }
 0x1cf   : > { %742 = dma.done.wait (!%p530_p6), %s379_s11, 128  }
 0x1d0   : > { %744 = vsyncadd (!%p530_p6), %s379_s11, 4294967168  ;;  %s22_s17 = sadd.s32 1, %s767_s17   ;;  %s1091_s25 = sld [smem:[#allocation15_spill]] }
 0x1d1   : > { %p19_p13 = scmp.ge.s32.totalorder %s22_s17, 4   ;;  %s1092_s15 = sld [smem:[#allocation13_spill]] }
 0x1d2   : > { %s1093_s16 = sld [smem:[#allocation14_spill]]  ;;  %s1094_s12 = smov %s751_s13 }
 0x1d3   : > { %s1095_s13 = smov %s755_s14  ;;  %21 = sbr.rel (!%p19_p13) target bundleno = 10 (0xa), region = 109 }
 0x1d6   : > { %s1096_s14 = smov %s1091_s25 }
 0x1da   :  { %384 = vsyncpa [#allocation4], 1 }
 0x1db   :  { %386 = vsyncpa [#allocation4 + $0x1], 1 }
 0x1dc   :  { %387 = vsyncpa [#allocation7], 1 }
 0x1dd   :  { %389 = vsyncpa [#allocation7 + $0x1], 1 }
 0x1de   :  { %390 = vsyncpa [#allocation5], 1 }
 0x1df   :  { %392 = vsyncpa [#allocation5 + $0x1], 1 }

</bundles_post_ra>
